<compile_context>
chip_gen: v6e
topology: v6e:2x2x1
jax: 0.10.0
libtpu: 0.0.40
codegen_flags: <defaults>
</compile_context>

<pallas_src>
import numpy as np
import jax
import jax.numpy as jnp
from jax import lax
from jax.experimental import pallas as pl
from jax.experimental.pallas import tpu as pltpu


def _sigmoid(x):
    # sigmoid(x) = 0.5 * (tanh(x/2) + 1): one EUP op instead of exp+recip (exact).
    return 0.5 * (jnp.tanh(0.5 * x) + 1.0)


# ----------------------------------------------------------------------------
# Pallas kernel: fused single-step LSTM cell
#   gates = [x | hx] @ [W_in ; W_hh]        (one MXU matmul, bf16 operands)
#   i,f,g,o = split(gates); cy = f*cx + i*g; hy = o*tanh(cy)   (VPU/EUP, f32)
# ----------------------------------------------------------------------------
def _tt_lstm_cell_kernel(xh_ref, cx_ref, w_ref, hy_ref, cy_ref):
    H = cx_ref.shape[-1]

    gates = jnp.dot(xh_ref[...], w_ref[...],
                    preferred_element_type=jnp.float32)

    in_gate = _sigmoid(gates[:, 0 * H:1 * H])
    forget_gate = _sigmoid(gates[:, 1 * H:2 * H])
    cell_gate = jnp.tanh(gates[:, 2 * H:3 * H])
    out_gate = _sigmoid(gates[:, 3 * H:4 * H])

    cy = forget_gate * cx_ref[...] + in_gate * cell_gate
    hy = out_gate * jnp.tanh(cy)

    cy_ref[...] = cy.astype(cy_ref.dtype)
    hy_ref[...] = hy.astype(hy_ref.dtype)


def fuse_weights(w_in, w_hh, compute_dtype=jnp.bfloat16):
    """Concatenate [W_in ; W_hh] along K once (hoist out of any outer step loop)."""
    return jnp.concatenate([w_in, w_hh], axis=0).astype(compute_dtype)


def tt_lstm_cell(x, hx, cx, w_fused):
    """One TT-LSTM cell step (matches TTLSTMCell.forward).

    x:        [B, input_size]
    hx, cx:   [B, hidden_size]
    w_fused:  [input_size + hidden_size, 4*hidden_size], made by fuse_weights()
              (its dtype is the MXU operand dtype; bf16 recommended).
    returns (hy, cy), each [B, hidden_size] f32.
    """
    B, H = hx.shape
    In = x.shape[-1]
    compute_dtype = w_fused.dtype

    xh = jnp.concatenate([x, hx], axis=-1).astype(compute_dtype)
    cx = cx.astype(jnp.float32)

    vmem = pl.BlockSpec(memory_space=pltpu.MemorySpace.VMEM)
    cost = pl.CostEstimate(
        flops=int(2 * B * (In + H) * 4 * H),
        transcendentals=int(5 * B * H),
        bytes_accessed=int(xh.size * xh.dtype.itemsize
                           + w_fused.size * w_fused.dtype.itemsize
                           + 3 * B * H * 4),
    )
    hy, cy = pl.pallas_call(
        _tt_lstm_cell_kernel,
        out_shape=(jax.ShapeDtypeStruct((B, H), jnp.float32),
                   jax.ShapeDtypeStruct((B, H), jnp.float32)),
        in_specs=[vmem, vmem, vmem],
        out_specs=(vmem, vmem),
        input_output_aliases={1: 1},     # cx buffer reused for cy
        cost_estimate=cost,
    )(xh, cx, w_fused)
    return hy, cy


# ----------------------------------------------------------------------------
# Pallas kernel 1 (sequence path): hoisted input projection
#   gates_x = xs.reshape(T*B, In) @ W_in   -- one large MXU-efficient GEMM,
#   'parallel' grid over row blocks.
# ----------------------------------------------------------------------------
def _input_proj_kernel(x_ref, w_ref, gx_ref):
    gx_ref[...] = jnp.dot(x_ref[...], w_ref[...],
                          preferred_element_type=jnp.float32
                          ).astype(gx_ref.dtype)


# ----------------------------------------------------------------------------
# Pallas kernel 2 (sequence path): blocked recurrence
#   Per grid step: T_blk timesteps.  Per timestep only h @ W_hh (MXU) plus
#   f32 gating; h/c carried in VMEM scratch across grid steps; W_hh resident.
# ----------------------------------------------------------------------------
def _tt_lstm_rec_kernel(gx_ref, h0_ref, c0_ref, whh_ref,
                        hseq_ref, hT_ref, cT_ref, h_scr, c_scr):
    tb = pl.program_id(0)
    t_blk = hseq_ref.shape[0]
    H = h0_ref.shape[-1]

    @pl.when(tb == 0)
    def _():
        h_scr[...] = h0_ref[...].astype(jnp.float32)
        c_scr[...] = c0_ref[...].astype(jnp.float32)

    def step(s, carry):
        h = h_scr[...]
        c = c_scr[...]
        # Hidden-to-hidden projection is the only per-step MXU work; the
        # input projection has been hoisted into gx_ref.
        gates = gx_ref[s] + jnp.dot(h.astype(whh_ref.dtype), whh_ref[...],
                                    preferred_element_type=jnp.float32)

        in_gate = _sigmoid(gates[:, 0 * H:1 * H])
        forget_gate = _sigmoid(gates[:, 1 * H:2 * H])
        cell_gate = jnp.tanh(gates[:, 2 * H:3 * H])
        out_gate = _sigmoid(gates[:, 3 * H:4 * H])

        c = forget_gate * c + in_gate * cell_gate
        h = out_gate * jnp.tanh(c)

        h_scr[...] = h
        c_scr[...] = c
        hseq_ref[s] = h.astype(hseq_ref.dtype)
        return carry

    lax.fori_loop(0, t_blk, step, 0, unroll=True)

    # Final states written exactly once (no per-step cast/store).
    @pl.when(tb == pl.num_programs(0) - 1)
    def _():
        hT_ref[...] = h_scr[...].astype(hT_ref.dtype)
        cT_ref[...] = c_scr[...].astype(cT_ref.dtype)


def _pick_t_block(T, t_block):
    t = max(1, min(int(t_block), T))
    while T % t != 0:
        t -= 1
    return t


def tt_lstm_sequence(xs, h0, c0, w_in, w_hh, *, t_block=8,
                     compute_dtype=jnp.bfloat16, out_dtype=jnp.float32,
                     vmem_limit_bytes=None):
    """Step the TT-LSTM cell over a sequence.

    xs: [T, B, input_size];  h0, c0: [B, hidden_size]
    w_in: [input_size, 4*hidden_size] (dense TTLinear reconstruction)
    w_hh: [hidden_size, 4*hidden_size]
    returns (h_seq [T,B,H] out_dtype, h_T [B,H] f32, c_T [B,H] f32).
    """
    T, B, In = xs.shape
    H = h0.shape[-1]
    t_blk = _pick_t_block(T, t_block)
    n_blk = T // t_blk

    w_in_c = w_in.astype(compute_dtype)
    w_hh_c = w_hh.astype(compute_dtype)
    x2 = xs.reshape(T * B, In).astype(compute_dtype)
    h0 = h0.astype(jnp.float32)
    c0 = c0.astype(jnp.float32)

    # ---- Pass 1: hoisted input projection (one big 'parallel' GEMM) ----
    m_blk = t_blk * B
    proj_cost = pl.CostEstimate(
        flops=int(2 * T * B * In * 4 * H),
        transcendentals=0,
        bytes_accessed=int(x2.size * x2.dtype.itemsize
                           + w_in_c.size * w_in_c.dtype.itemsize
                           + T * B * 4 * H * 4),
    )
    gx2 = pl.pallas_call(
        _input_proj_kernel,
        out_shape=jax.ShapeDtypeStruct((T * B, 4 * H), jnp.float32),
        grid_spec=pltpu.PrefetchScalarGridSpec(
            num_scalar_prefetch=0,
            grid=(n_blk,),
            in_specs=[pl.BlockSpec((m_blk, In), lambda i: (i, 0)),
                      pl.BlockSpec((In, 4 * H), lambda i: (0, 0))],   # resident
            out_specs=pl.BlockSpec((m_blk, 4 * H), lambda i: (i, 0)),
        ),
        compiler_params=pltpu.CompilerParams(
            dimension_semantics=("parallel",),
            vmem_limit_bytes=vmem_limit_bytes),
        cost_estimate=proj_cost,
    )(x2, w_in_c)
    gx = gx2.reshape(T, B, 4 * H)   # contiguous -> metadata-only reshape

    # ---- Pass 2: recurrence, t_blk timesteps per grid step ----
    rec_cost = pl.CostEstimate(
        flops=int(2 * T * B * H * 4 * H),
        transcendentals=int(5 * T * B * H),
        bytes_accessed=int(T * B * 4 * H * 4
                           + w_hh_c.size * w_hh_c.dtype.itemsize
                           + T * B * H * jnp.dtype(out_dtype).itemsize
                           + 4 * B * H * 4),
    )
    # TODO(synk): for B >= 16 add a leading 'parallel' batch-tile grid axis
    # (>= 8 rows per tile) so v7x's second TensorCore is used.
    # TODO(synk): for large H (>~1.2k) tile the 4H gate axis (reorder weight
    # columns gate-major per hidden slice so gating stays tile-local) and
    # re-derive the resident-weight VMEM budget (v7x: 64 MiB vs 128 MiB).
    hseq, hT, cT = pl.pallas_call(
        _tt_lstm_rec_kernel,
        out_shape=(jax.ShapeDtypeStruct((T, B, H), out_dtype),
                   jax.ShapeDtypeStruct((B, H), jnp.float32),
                   jax.ShapeDtypeStruct((B, H), jnp.float32)),
        grid_spec=pltpu.PrefetchScalarGridSpec(
            num_scalar_prefetch=0,
            grid=(n_blk,),
            in_specs=[
                pl.BlockSpec((t_blk, B, 4 * H), lambda i: (i, 0, 0)),  # gates_x
                pl.BlockSpec((B, H), lambda i: (0, 0)),                # h0 (resident)
                pl.BlockSpec((B, H), lambda i: (0, 0)),                # c0 (resident)
                pl.BlockSpec((H, 4 * H), lambda i: (0, 0)),            # W_hh (resident)
            ],
            out_specs=(
                pl.BlockSpec((t_blk, B, H), lambda i: (i, 0, 0)),      # h_t blocks
                pl.BlockSpec((B, H), lambda i: (0, 0)),                # h_T
                pl.BlockSpec((B, H), lambda i: (0, 0)),                # c_T
            ),
            scratch_shapes=[pltpu.VMEM((B, H), jnp.float32),           # h carry
                            pltpu.VMEM((B, H), jnp.float32)],          # c carry
        ),
        compiler_params=pltpu.CompilerParams(
            dimension_semantics=("arbitrary",),
            vmem_limit_bytes=vmem_limit_bytes),
        cost_estimate=rec_cost,
    )(gx, h0, c0, w_hh_c)
    return hseq, hT, cT


# ----------------------------------------------------------------------------
# Parameter setup (glue, plain JAX) — TT cores -> dense matrix
# ----------------------------------------------------------------------------
def make_tt_cores(key, in_shape, out_shape, ranks):
    """TT-matrix cores: core k has shape (r_{k-1}, m_k, n_k, r_k)."""
    d = len(in_shape)
    cores = []
    keys = jax.random.split(key, d)
    for k in range(d):
        shape = (ranks[k], in_shape[k], out_shape[k], ranks[k + 1])
        cores.append(jax.random.uniform(keys[k], shape, jnp.float32,
                                        minval=-0.3, maxval=0.3))
    return cores


def tt_to_dense(cores, in_shape, out_shape):
    """Contract TT cores into a dense [prod(in_shape), prod(out_shape)] matrix."""
    # TODO(synk): the exact factorized index ordering of the original TTLinear
    # is not shown in the reference; this uses the standard row-major
    # TT-matrix convention, which is consistent since weights are synthetic.
    d = len(cores)
    res = cores[0].reshape(in_shape[0], out_shape[0], -1)   # (m1, n1, r1)
    for k in range(1, d):
        core = cores[k]                                      # (r_{k-1}, m, n, r)
        res = jnp.einsum('abr,rmns->ambns', res, core)
        M = res.shape[0] * res.shape[1]
        N = res.shape[2] * res.shape[3]
        res = res.reshape(M, N, -1)
    M = int(np.prod(in_shape))
    N = int(np.prod(out_shape))
    return res.reshape(M, N)


# ----------------------------------------------------------------------------
# Pure-JAX references (mirror the PyTorch module: split matmuls, f32 gating)
# ----------------------------------------------------------------------------
def reference_cell(x, hx, cx, w_in, w_hh, compute_dtype=jnp.bfloat16):
    H = hx.shape[-1]
    in2hid = jnp.dot(x.astype(compute_dtype), w_in.astype(compute_dtype),
                     preferred_element_type=jnp.float32)
    hid2hid = jnp.dot(hx.astype(compute_dtype), w_hh.astype(compute_dtype),
                      preferred_element_type=jnp.float32)
    gates = in2hid + hid2hid
    i = jax.nn.sigmoid(gates[:, :H])
    f = jax.nn.sigmoid(gates[:, H:2 * H])
    g = jnp.tanh(gates[:, 2 * H:3 * H])
    o = jax.nn.sigmoid(gates[:, 3 * H:])
    cy = f * cx.astype(jnp.float32) + i * g
    hy = o * jnp.tanh(cy)
    return hy, cy


def reference_sequence(xs, h0, c0, w_in, w_hh, compute_dtype=jnp.bfloat16):
    h, c = h0.astype(jnp.float32), c0.astype(jnp.float32)
    hs = []
    for t in range(xs.shape[0]):
        h, c = reference_cell(xs[t], h, c, w_in, w_hh, compute_dtype)
        hs.append(h)
    return jnp.stack(hs, axis=0), h, c


if __name__ == "__main__":
    # Module configuration (mirrors TTLSTMCell.__init__)
    in_shape = [4, 8, 4]          # input_size  = 128
    hid_shape = [4, 8, 4]         # hidden_size = 128
    ranks = [1, 2, 2, 1]

    input_size = int(np.prod(in_shape))
    hidden_size = int(np.prod(hid_shape))
    # _set_hidden_shape: first factor of the hidden shape is multiplied by 4
    all_gate_hidden = [hid_shape[0] * 4] + hid_shape[1:]   # -> prod = 4*hidden

    B = 8
    T = 16
    key = jax.random.PRNGKey(0)
    k_x, k_h, k_c, k_tt, k_hh, k_xs = jax.random.split(key, 6)

    # Inputs / state
    x = jax.random.normal(k_x, (B, input_size), jnp.float32)
    hx = jax.random.normal(k_h, (B, hidden_size), jnp.float32)
    cx = jax.random.normal(k_c, (B, hidden_size), jnp.float32)
    xs = jax.random.normal(k_xs, (T, B, input_size), jnp.float32)

    # TTLinear (input-to-hidden) parameters -> dense [input_size, 4*hidden]
    cores = make_tt_cores(k_tt, in_shape, all_gate_hidden, ranks)
    w_in = tt_to_dense(cores, in_shape, all_gate_hidden)
    assert w_in.shape == (input_size, 4 * hidden_size)

    # hidden_weights: nn.Linear(hidden_size, 4*hidden_size, bias=False)
    # reset_params: uniform(-sqrt(1/H), sqrt(1/H)); stored transposed ([H,4H])
    k_lim = (1.0 / hidden_size) ** 0.5
    w_hh = jax.random.uniform(k_hh, (hidden_size, 4 * hidden_size),
                              jnp.float32, minval=-k_lim, maxval=k_lim)

    # ---- single step, bf16 MXU operands (default fast path) ----
    w_fused = fuse_weights(w_in, w_hh, jnp.bfloat16)   # hoisted: build once
    hy, cy = tt_lstm_cell(x, hx, cx, w_fused)
    jax.block_until_ready((hy, cy))
    hy_ref, cy_ref = reference_cell(x, hx, cx, w_in, w_hh, jnp.bfloat16)
    np.testing.assert_allclose(np.asarray(hy), np.asarray(hy_ref),
                               rtol=2e-2, atol=2e-2)
    np.testing.assert_allclose(np.asarray(cy), np.asarray(cy_ref),
                               rtol=2e-2, atol=2e-2)

    # ---- whole sequence, bf16 MXU operands (hoisted input GEMM + blocked rec) ----
    hseq, hT, cT = tt_lstm_sequence(xs, hx, cx, w_in, w_hh, t_block=8)
    jax.block_until_ready((hseq, hT, cT))
    hseq_ref, hT_ref, cT_ref = reference_sequence(xs, hx, cx, w_in, w_hh,
                                                  jnp.bfloat16)
    np.testing.assert_allclose(np.asarray(hseq), np.asarray(hseq_ref),
                               rtol=2e-2, atol=2e-2)
    np.testing.assert_allclose(np.asarray(hT), np.asarray(hT_ref),
                               rtol=2e-2, atol=2e-2)
    np.testing.assert_allclose(np.asarray(cT), np.asarray(cT_ref),
                               rtol=2e-2, atol=2e-2)

    # ---- whole sequence, f32 operands (explicit opt-in, no HIGHEST knob) ----
    hseq32, hT32, cT32 = tt_lstm_sequence(xs, hx, cx, w_in, w_hh, t_block=8,
                                          compute_dtype=jnp.float32)
    jax.block_until_ready((hseq32, hT32, cT32))
    hseq32_ref, hT32_ref, cT32_ref = reference_sequence(xs, hx, cx, w_in, w_hh,
                                                        jnp.float32)
    np.testing.assert_allclose(np.asarray(hseq32), np.asarray(hseq32_ref),
                               rtol=2e-2, atol=2e-2)
    np.testing.assert_allclose(np.asarray(cT32), np.asarray(cT32_ref),
                               rtol=2e-2, atol=2e-2)

    print("KERNEL_OK")
</pallas_src>

<mosaic_0001>
module attributes {stable_mosaic.version = 11 : i64} {
  func.func @_tt_lstm_cell_kernel(%arg0: memref<8x256xbf16, #tpu.memory_space<vmem>>, %arg1: memref<8x128xf32, #tpu.memory_space<vmem>>, %arg2: memref<256x512xbf16, #tpu.memory_space<vmem>>, %arg3: memref<8x128xf32, #tpu.memory_space<vmem>>, %arg4: memref<8x128xf32, #tpu.memory_space<vmem>>) attributes {dimension_semantics = [], scalar_prefetch = 0 : i64, scratch_operands = 0 : i64, tpu.core_type = #tpu.core_type<tc>} {
    %c0 = arith.constant 0 : index
    %c0_0 = arith.constant 0 : index
    %0 = vector.load %arg0[%c0, %c0_0] : memref<8x256xbf16, #tpu.memory_space<vmem>>, vector<8x256xbf16>
    %c0_1 = arith.constant 0 : index
    %c0_2 = arith.constant 0 : index
    %1 = vector.load %arg2[%c0_1, %c0_2] : memref<256x512xbf16, #tpu.memory_space<vmem>>, vector<256x512xbf16>
    %cst = arith.constant dense<0.000000e+00> : vector<8x512xf32>
    %2 = tpu.matmul %0, %1, %cst {dimension_numbers = #tpu.dot_dimension_numbers<[1], [0], [0], [1], [0, 0, 1, 1], [], []>} : vector<8x256xbf16>, vector<256x512xbf16>, vector<8x512xf32> -> vector<8x512xf32>
    %3 = vector.extract_strided_slice %2 {offsets = [0, 0], sizes = [8, 128], strides = [1, 1]} : vector<8x512xf32> to vector<8x128xf32>
    %cst_3 = arith.constant 5.000000e-01 : f32
    %4 = vector.broadcast %cst_3 : f32 to vector<8x128xf32>
    %5 = arith.mulf %4, %3 : vector<8x128xf32>
    %6 = math.tanh %5 : vector<8x128xf32>
    %cst_4 = arith.constant 1.000000e+00 : f32
    %7 = vector.broadcast %cst_4 : f32 to vector<8x128xf32>
    %8 = arith.addf %6, %7 : vector<8x128xf32>
    %cst_5 = arith.constant 5.000000e-01 : f32
    %9 = vector.broadcast %cst_5 : f32 to vector<8x128xf32>
    %10 = arith.mulf %9, %8 : vector<8x128xf32>
    %11 = vector.extract_strided_slice %2 {offsets = [0, 128], sizes = [8, 128], strides = [1, 1]} : vector<8x512xf32> to vector<8x128xf32>
    %cst_6 = arith.constant 5.000000e-01 : f32
    %12 = vector.broadcast %cst_6 : f32 to vector<8x128xf32>
    %13 = arith.mulf %12, %11 : vector<8x128xf32>
    %14 = math.tanh %13 : vector<8x128xf32>
    %cst_7 = arith.constant 1.000000e+00 : f32
    %15 = vector.broadcast %cst_7 : f32 to vector<8x128xf32>
    %16 = arith.addf %14, %15 : vector<8x128xf32>
    %cst_8 = arith.constant 5.000000e-01 : f32
    %17 = vector.broadcast %cst_8 : f32 to vector<8x128xf32>
    %18 = arith.mulf %17, %16 : vector<8x128xf32>
    %19 = vector.extract_strided_slice %2 {offsets = [0, 256], sizes = [8, 128], strides = [1, 1]} : vector<8x512xf32> to vector<8x128xf32>
    %20 = math.tanh %19 : vector<8x128xf32>
    %21 = vector.extract_strided_slice %2 {offsets = [0, 384], sizes = [8, 128], strides = [1, 1]} : vector<8x512xf32> to vector<8x128xf32>
    %cst_9 = arith.constant 5.000000e-01 : f32
    %22 = vector.broadcast %cst_9 : f32 to vector<8x128xf32>
    %23 = arith.mulf %22, %21 : vector<8x128xf32>
    %24 = math.tanh %23 : vector<8x128xf32>
    %cst_10 = arith.constant 1.000000e+00 : f32
    %25 = vector.broadcast %cst_10 : f32 to vector<8x128xf32>
    %26 = arith.addf %24, %25 : vector<8x128xf32>
    %cst_11 = arith.constant 5.000000e-01 : f32
    %27 = vector.broadcast %cst_11 : f32 to vector<8x128xf32>
    %28 = arith.mulf %27, %26 : vector<8x128xf32>
    %c0_12 = arith.constant 0 : index
    %c0_13 = arith.constant 0 : index
    %29 = vector.load %arg1[%c0_12, %c0_13] : memref<8x128xf32, #tpu.memory_space<vmem>>, vector<8x128xf32>
    %30 = arith.mulf %18, %29 : vector<8x128xf32>
    %31 = arith.mulf %10, %20 : vector<8x128xf32>
    %32 = arith.addf %30, %31 : vector<8x128xf32>
    %33 = math.tanh %32 : vector<8x128xf32>
    %34 = arith.mulf %28, %33 : vector<8x128xf32>
    %c0_14 = arith.constant 0 : index
    %c0_15 = arith.constant 0 : index
    %35 = vector.load %arg4[%c0_14, %c0_15] : memref<8x128xf32, #tpu.memory_space<vmem>>, vector<8x128xf32>
    tpu.vector_store %arg4[%c0_14, %c0_15], %32 {strides = array<i32>} : memref<8x128xf32, #tpu.memory_space<vmem>>, vector<8x128xf32>,
    %c0_16 = arith.constant 0 : index
    %c0_17 = arith.constant 0 : index
    %36 = vector.load %arg3[%c0_16, %c0_17] : memref<8x128xf32, #tpu.memory_space<vmem>>, vector<8x128xf32>
    tpu.vector_store %arg3[%c0_16, %c0_17], %34 {strides = array<i32>} : memref<8x128xf32, #tpu.memory_space<vmem>>, vector<8x128xf32>,
    return
  }
}

</mosaic_0001>

<bundles_post_ra>
// kernel: tpu_custom_call.1
= control target key start
LH: loop header
LB: loop body
LE: loop exit
PB: predicated region body
PF: predicated region fallthrough
CT: control target
= control target key end

     0   :  { %10 = vsyncpa [#allocation3], 0  ;;  %s883_s0 = inlined_call_operand.vmem [shape: bf16[8,256], index: 0, kind: input, shape index: {}]   ;;  %s884_s1 = inlined_call_operand.hbm [shape: f32[8,128], index: 1, kind: input, shape index: {}, may-alias: {1,4}]   ;;  %s885_s2 = inlined_call_operand.hbm [shape: bf16[256,512], index: 2, kind: input, shape index: {}]   ;;  %s886_s3 = inlined_call_operand.hbm [shape: f32[8,128], index: 3, kind: output, shape index: {0}]   ;;  %s887_s4 = inlined_call_operand.hbm [shape: f32[8,128], index: 4, kind: output, shape index: {1}, may-alias: {1,4}]  }
   0x1   :  { %11 = vsyncpa [#allocation6], 0 }
   0x2   :  { %12 = vsyncpa [#allocation4], 0 }
   0x3   :  { %13 = vsyncpa [#allocation9], 0  ;;  %s837_s15 = smov [#allocation2]   ;;  %s838_s17 = smov [#allocation5]  }
   0x4   :  { %s22_s16 = sshll.u32 %s837_s15, 4  ;;  %s31_s18 = sshll.u32 %s838_s17, 4  ;;  %s23_s16 = int_to_ptr.vmem [resolvable:$true] %s22_s16  ;;  %s32_s18 = int_to_ptr.vmem [resolvable:$true] %s31_s18 }
   0x5   :  { %s757_s19 = scalar_lea.vmem %s23_s16, 128  ;;  %p762_p1 = scmp.lt.s32.totalorder %s23_s16, %s23_s16 }
   0x6   :  { %p758_p0 = scmp.ne.s32.totalorder %s23_s16, %s757_s19  ;;  %p763_p2 = scmp.lt.s32.totalorder %s757_s19, %s757_s19 }
   0x8   :  { %p764_p3 = por %p763_p2, %p762_p1 }
   0xa   :  { %p765_p4 = pnand %p764_p3, %p758_p0 }
   0xc   :  { %768 = shalt.err (!%p765_p4)
}
   0xd   :  { %25 = dma.hbm_to_vmem [thread:$0]  %s884_s1, 128, %s23_s16, [#allocation3]  }
   0xe   :  { %s777_s22 = scalar_lea.vmem %s32_s18, 8192  ;;  %p782_p6 = scmp.lt.s32.totalorder %s32_s18, %s32_s18 }
   0xf   :  { %p778_p5 = scmp.ne.s32.totalorder %s32_s18, %s777_s22  ;;  %p783_p7 = scmp.lt.s32.totalorder %s777_s22, %s777_s22 }
  0x11   :  { %p784_p8 = por %p783_p7, %p782_p6 }
  0x13   :  { %p785_p9 = pnand %p784_p8, %p778_p5 }
  0x15   :  { %788 = shalt.err (!%p785_p9)
}
  0x16   :  { %s839_s23 = smov 256   ;;  %s840_s24 = smov 16  }
  0x17   :  { %37 = dma.hbm_to_vmem [thread:$0]  %s885_s2, 8192, %s32_s18, [#allocation6], %s839_s23, %s839_s23, %s840_s24  }
  0x18   :  { %829 = dma.done.wait [#allocation3], 128  }
  0x19   :  { %830 = vsyncadd [#allocation3], 4294967168 }
  0x1a   :  { %831 = dma.done.wait [#allocation6], 8192  }
  0x1b   :  { %832 = vsyncadd [#allocation6], 4294959104  ;;  %v641_v0 = vld [vmem:[#allocation5 + $0xe4] ss:$16 sps:$4 sm:$0xff]   ;;  %v643_v1 = vld [vmem:[#allocation5 + $0xe0] ss:$16 sps:$4 sm:$0xff]  }
  0x1c   :  { %436 = vmatprep.subr.bf16.mxu0 %v641_v0  ;;  %v644_v2 = vld [vmem:[#allocation5 + $0xec] ss:$16 sps:$4 sm:$0xff]   ;;  %v646_v3 = vld [vmem:[#allocation5 + $0xe8] ss:$16 sps:$4 sm:$0xff]   ;;  %v647_v4 = vld [vmem:[#allocation5 + $0xc4] ss:$16 sps:$4 sm:$0xff]  }
  0x1d   :  { %437 = vmatpush1.bf16.msra.mxu0 %v643_v1  ;;  %v649_v5 = vld [vmem:[#allocation5 + $0xc0] ss:$16 sps:$4 sm:$0xff]   ;;  %477 = vmatprep.subr.bf16.mxu1 %v644_v2  ;;  %v650_v6 = vld [vmem:[#allocation5 + $0xcc] ss:$16 sps:$4 sm:$0xff]   ;;  %v652_v7 = vld [vmem:[#allocation5 + $0xc8] ss:$16 sps:$4 sm:$0xff]  }
  0x1e   :  { %478 = vmatpush1.bf16.msra.mxu1 %v646_v3  ;;  %438 = vmatprep.subr.bf16.mxu0 %v647_v4  ;;  %v653_v8 = vld [vmem:[#allocation5 + $0xa4] ss:$16 sps:$4 sm:$0xff]   ;;  %v655_v9 = vld [vmem:[#allocation5 + $0xa0] ss:$16 sps:$4 sm:$0xff]   ;;  %v656_v10 = vld [vmem:[#allocation5 + $0xac] ss:$16 sps:$4 sm:$0xff]  }
  0x1f   :  { %479 = vmatprep.subr.bf16.mxu1 %v650_v6  ;;  %v659_v11 = vld [vmem:[#allocation5 + $0x84] ss:$16 sps:$4 sm:$0xff]   ;;  %v658_v12 = vld [vmem:[#allocation5 + $0xa8] ss:$16 sps:$4 sm:$0xff]   ;;  %v662_v13 = vld [vmem:[#allocation5 + $0x8c] ss:$16 sps:$4 sm:$0xff]  }
  0x20   :  { %v661_v14 = vld [vmem:[#allocation5 + $0x80] ss:$16 sps:$4 sm:$0xff]   ;;  %v665_v15 = vld [vmem:[#allocation5 + $0x64] ss:$16 sps:$4 sm:$0xff]   ;;  %v664_v16 = vld [vmem:[#allocation5 + $0x88] ss:$16 sps:$4 sm:$0xff]  }
  0x21   :  { %439 = vmatpush1.bf16.msra.mxu0 %v649_v5  ;;  %v668_v17 = vld [vmem:[#allocation5 + $0x6c] ss:$16 sps:$4 sm:$0xff]   ;;  %v667_v18 = vld [vmem:[#allocation5 + $0x60] ss:$16 sps:$4 sm:$0xff]   ;;  %v671_v19 = vld [vmem:[#allocation5 + $0x44] ss:$16 sps:$4 sm:$0xff]  }
  0x22   :  { %440 = vmatprep.subr.bf16.mxu0 %v653_v8  ;;  %480 = vmatpush1.bf16.msra.mxu1 %v652_v7  ;;  %v670_v20 = vld [vmem:[#allocation5 + $0x68] ss:$16 sps:$4 sm:$0xff]   ;;  %v674_v21 = vld [vmem:[#allocation5 + $0x4c] ss:$16 sps:$4 sm:$0xff]   ;;  %v673_v22 = vld [vmem:[#allocation5 + $0x40] ss:$16 sps:$4 sm:$0xff]  }
  0x23   :  { %481 = vmatprep.subr.bf16.mxu1 %v656_v10  ;;  %v677_v23 = vld [vmem:[#allocation5 + $0x24] ss:$16 sps:$4 sm:$0xff]   ;;  %v676_v24 = vld [vmem:[#allocation5 + $0x48] ss:$16 sps:$4 sm:$0xff]   ;;  %v680_v25 = vld [vmem:[#allocation5 + $0x2c] ss:$16 sps:$4 sm:$0xff]  }
  0x24   :  { %v679_v26 = vld [vmem:[#allocation5 + $0x20] ss:$16 sps:$4 sm:$0xff]   ;;  %v683_v27 = vld [vmem:[#allocation5 + $0x4] ss:$16 sps:$4 sm:$0xff]   ;;  %v682_v28 = vld [vmem:[#allocation5 + $0x28] ss:$16 sps:$4 sm:$0xff]  }
  0x25   :  { %441 = vmatpush1.bf16.msra.mxu0 %v655_v9  ;;  %v686_v29 = vld [vmem:[#allocation5 + $0xc] ss:$16 sps:$4 sm:$0xff]   ;;  %v685_v30 = vld [vmem:[#allocation5] ss:$16 sps:$4 sm:$0xff]   ;;  %v689_v31 = vld [vmem:[#allocation5 + $0x1e4] ss:$16 sps:$4 sm:$0xff]  }
  0x26   :  { %442 = vmatprep.subr.bf16.mxu0 %v659_v11  ;;  %482 = vmatpush1.bf16.msra.mxu1 %v658_v12  ;;  %v688_v32 = vld [vmem:[#allocation5 + $0x8] ss:$16 sps:$4 sm:$0xff]   ;;  %v692_v33 = vld [vmem:[#allocation5 + $0x1ec] ss:$16 sps:$4 sm:$0xff]   ;;  %v691_v34 = vld [vmem:[#allocation5 + $0x1e0] ss:$16 sps:$4 sm:$0xff]  }
  0x27   :  { %483 = vmatprep.subr.bf16.mxu1 %v662_v13  ;;  %v695_v35 = vld [vmem:[#allocation5 + $0x1c4] ss:$16 sps:$4 sm:$0xff]   ;;  %v694_v36 = vld [vmem:[#allocation5 + $0x1e8] ss:$16 sps:$4 sm:$0xff]   ;;  %v698_v37 = vld [vmem:[#allocation5 + $0x1cc] ss:$16 sps:$4 sm:$0xff]  }
  0x28   :  { %v697_v38 = vld [vmem:[#allocation5 + $0x1c0] ss:$16 sps:$4 sm:$0xff]   ;;  %v701_v39 = vld [vmem:[#allocation5 + $0x1a4] ss:$16 sps:$4 sm:$0xff]   ;;  %v700_v40 = vld [vmem:[#allocation5 + $0x1c8] ss:$16 sps:$4 sm:$0xff]  }
  0x29   :  { %443 = vmatpush1.bf16.msra.mxu0 %v661_v14  ;;  %v704_v41 = vld [vmem:[#allocation5 + $0x1ac] ss:$16 sps:$4 sm:$0xff]   ;;  %v703_v42 = vld [vmem:[#allocation5 + $0x1a0] ss:$16 sps:$4 sm:$0xff]   ;;  %v707_v43 = vld [vmem:[#allocation5 + $0x184] ss:$16 sps:$4 sm:$0xff]  }
  0x2a   :  { %444 = vmatprep.subr.bf16.mxu0 %v665_v15  ;;  %484 = vmatpush1.bf16.msra.mxu1 %v664_v16  ;;  %v706_v44 = vld [vmem:[#allocation5 + $0x1a8] ss:$16 sps:$4 sm:$0xff]   ;;  %v710_v45 = vld [vmem:[#allocation5 + $0x18c] ss:$16 sps:$4 sm:$0xff]   ;;  %v709_v47 = vld [vmem:[#allocation5 + $0x180] ss:$16 sps:$4 sm:$0xff]  }
  0x2b   :  { %485 = vmatprep.subr.bf16.mxu1 %v668_v17  ;;  %v44_v46 = vld [vmem:[%s883_s0] sm:$0xff]  ;;  %v713_v49 = vld [vmem:[#allocation5 + $0x164] ss:$16 sps:$4 sm:$0xff]   ;;  %v715_v52 = vld [vmem:[#allocation5 + $0x160] ss:$16 sps:$4 sm:$0xff]   ;;  %s841_s0 = smov [#allocation8]  }
  0x2c   :  { %v570_v48 = vcombine.high %v44_v46, %v44_v46  ;;  %v712_v50 = vld [vmem:[#allocation5 + $0x188] ss:$16 sps:$4 sm:$0xff]   ;;  %v716_v51 = vld [vmem:[#allocation5 + $0x16c] ss:$16 sps:$4 sm:$0xff]   ;;  %v719_v53 = vld [vmem:[#allocation5 + $0x144] ss:$16 sps:$4 sm:$0xff]   ;;  %v569_v2 = vcombine.low %v44_v46, %v44_v46 }
  0x2d   :  { %445 = vmatpush1.bf16.msra.mxu0 %v667_v18  ;;  %v718_v54 = vld [vmem:[#allocation5 + $0x168] ss:$16 sps:$4 sm:$0xff]   ;;  %v722_v55 = vld [vmem:[#allocation5 + $0x14c] ss:$16 sps:$4 sm:$0xff]   ;;  %v721_v56 = vld [vmem:[#allocation5 + $0x140] ss:$16 sps:$4 sm:$0xff]  }
  0x2e   :  { %446 = vmatprep.subr.bf16.mxu0 %v671_v19  ;;  %486 = vmatpush1.bf16.msra.mxu1 %v670_v20  ;;  %v725_v57 = vld [vmem:[#allocation5 + $0x124] ss:$16 sps:$4 sm:$0xff]   ;;  %v724_v58 = vld [vmem:[#allocation5 + $0x148] ss:$16 sps:$4 sm:$0xff]   ;;  %v728_v59 = vld [vmem:[#allocation5 + $0x12c] ss:$16 sps:$4 sm:$0xff]  }
  0x2f   :  { %487 = vmatprep.subr.bf16.mxu1 %v674_v21  ;;  %468 = vmatprep.mubr.bf16.mxu0 %v570_v48  ;;  %v727_v60 = vld [vmem:[#allocation5 + $0x120] ss:$16 sps:$4 sm:$0xff]   ;;  %v731_v61 = vld [vmem:[#allocation5 + $0x104] ss:$16 sps:$4 sm:$0xff]   ;;  %v730_v62 = vld [vmem:[#allocation5 + $0x128] ss:$16 sps:$4 sm:$0xff]  }
  0x30   :  { %509 = vmatprep.mubr.bf16.mxu1 %v570_v48  ;;  %v734_v63 = vld [vmem:[#allocation5 + $0x10c] ss:$16 sps:$4 sm:$0xff]   ;;  %v733_v0 = vld [vmem:[#allocation5 + $0x100] ss:$16 sps:$4 sm:$0xff]   ;;  %v738_v1 = vld [vmem:[#allocation5 + $0x108] ss:$16 sps:$4 sm:$0xff]  }
  0x31   :  { %447 = vmatpush1.bf16.msra.mxu0 %v673_v22  ;;  %v531_v20 = vld [vmem:[#allocation2] sm:$0xff]  ;;  %s555_s27 = sshll.u32 %s841_s0, 4  ;;  %s556_s27 = int_to_ptr.vmem [resolvable:$true] %s555_s27 }
  0x32   :  { %448 = vmatprep.subr.bf16.mxu0 %v677_v23  ;;  %488 = vmatpush1.bf16.msra.mxu1 %v676_v24  ;;  %s789_s28 = scalar_lea.vmem %s556_s27, 128  ;;  %p794_p11 = scmp.lt.s32.totalorder %s556_s27, %s556_s27 }
  0x33   :  { %489 = vmatprep.subr.bf16.mxu1 %v680_v25  ;;  %p790_p10 = scmp.ne.s32.totalorder %s556_s27, %s789_s28  ;;  %p795_p12 = scmp.lt.s32.totalorder %s789_s28, %s789_s28 }
  0x35   :  { %449 = vmatpush1.bf16.msra.mxu0 %v679_v26  ;;  %p796_p13 = por %p795_p12, %p794_p11 }
  0x36   :  { %450 = vmatprep.subr.bf16.mxu0 %v683_v27  ;;  %490 = vmatpush1.bf16.msra.mxu1 %v682_v28 }
  0x37   :  { %491 = vmatprep.subr.bf16.mxu1 %v686_v29  ;;  %p797_p0 = pnand %p796_p13, %p790_p10 }
  0x39   :  { %451 = vmatpush1.bf16.msra.mxu0 %v685_v30 }
  0x3a   :  { %452 = vmatprep.subr.bf16.mxu0 %v689_v31  ;;  %492 = vmatpush1.bf16.msra.mxu1 %v688_v32 }
  0x3b   :  { %493 = vmatprep.subr.bf16.mxu1 %v692_v33 }
  0x3d   :  { %453 = vmatpush2.bf16.msra.mxu0 %v691_v34 }
  0x3e   :  { %454 = vmatprep.subr.bf16.mxu0 %v695_v35  ;;  %494 = vmatpush2.bf16.msra.mxu1 %v694_v36 }
  0x3f   :  { %495 = vmatprep.subr.bf16.mxu1 %v698_v37 }
  0x41   :  { %455 = vmatpush2.bf16.msra.mxu0 %v697_v38 }
  0x42   :  { %456 = vmatprep.subr.bf16.mxu0 %v701_v39  ;;  %496 = vmatpush2.bf16.msra.mxu1 %v700_v40 }
  0x43   :  { %497 = vmatprep.subr.bf16.mxu1 %v704_v41 }
  0x45   :  { %457 = vmatpush2.bf16.msra.mxu0 %v703_v42 }
  0x46   :  { %458 = vmatprep.subr.bf16.mxu0 %v707_v43  ;;  %498 = vmatpush2.bf16.msra.mxu1 %v706_v44 }
  0x47   :  { %499 = vmatprep.subr.bf16.mxu1 %v710_v45 }
  0x49   :  { %459 = vmatpush2.bf16.msra.mxu0 %v709_v47 }
  0x4a   :  { %460 = vmatprep.subr.bf16.mxu0 %v713_v49  ;;  %500 = vmatpush2.bf16.msra.mxu1 %v712_v50 }
  0x4b   :  { %501 = vmatprep.subr.bf16.mxu1 %v716_v51 }
  0x4d   :  { %461 = vmatpush2.bf16.msra.mxu0 %v715_v52 }
  0x4e   :  { %462 = vmatprep.subr.bf16.mxu0 %v719_v53  ;;  %502 = vmatpush2.bf16.msra.mxu1 %v718_v54 }
  0x4f   :  { %503 = vmatprep.subr.bf16.mxu1 %v722_v55 }
  0x51   :  { %463 = vmatpush2.bf16.msra.mxu0 %v721_v56 }
  0x52   :  { %464 = vmatprep.subr.bf16.mxu0 %v725_v57  ;;  %504 = vmatpush2.bf16.msra.mxu1 %v724_v58 }
  0x53   :  { %505 = vmatprep.subr.bf16.mxu1 %v728_v59 }
  0x55   :  { %465 = vmatpush2.bf16.msra.mxu0 %v727_v60 }
  0x56   :  { %466 = vmatprep.subr.bf16.mxu0 %v731_v61  ;;  %506 = vmatpush2.bf16.msra.mxu1 %v730_v62 }
  0x57   :  { %507 = vmatprep.subr.bf16.mxu1 %v734_v63 }
  0x59   :  { %467 = vmatpush2.bf16.msra.mxu0 %v733_v0 }
  0x5a   :  { %508 = vmatpush2.bf16.msra.mxu1 %v738_v1 }
  0x5c   :  { %469 = vmatmul.mubr.bf16.vlgmr.msra.gmra.mxu0 %v569_v2 }
  0x5d   :  { %510 = vmatmul.mubr.bf16.vlgmr.msra.gmra.mxu1 %v569_v2 }
 0x11c   :  { %v470_v3 = vpop.f32.mrf.mxu0 }
 0x11d   :  { %v518_v4 = vmul.f32 0.5, %v470_v3  ;;  %v511_v6 = vpop.f32.mrf.mxu1 }
 0x11e   :  { %v472_v5 = vpop.f32.mrf.mxu0 }
 0x11f   :  { %739 = vtanh.f32 %v518_v4  ;;  %v522_v7 = vmul.f32 0.5, %v472_v5  ;;  %v513_v9 = vpop.f32.mrf.mxu1 }
 0x120   :  { %v474_v8 = vpop.f32.mrf.mxu0  ;;  %v527_v13 = vmul.f32 0.5, %v513_v9 }
 0x121   :  { %741 = vtanh.f32 %v522_v7  ;;  %v515_v11 = vpop.f32.mrf.mxu1 }
 0x122   :  { %v475_v10 = vpop.f32.mrf.mxu0  ;;  %743 = vtanh.f32 %v511_v6 }
 0x123   :  { %v516_v12 = vpop.f32.mrf.mxu1  ;;  %745 = vtanh.f32 %v527_v13 }
 0x12c   :  { %v740_v14 = vpop.eup %739 }
 0x12d   :  { %v520_v15 = vadd.f32 1.0, %v740_v14 }
 0x12e   :  { %v742_v16 = vpop.eup %741 }
 0x12f   :  { %v521_v17 = vmul.f32 0.5, %v520_v15  ;;  %v524_v18 = vadd.f32 1.0, %v742_v16  ;;  %v744_v19 = vpop.eup %743 }
 0x131   :  { %v525_v21 = vmul.f32 0.5, %v524_v18  ;;  %v533_v23 = vmul.f32 %v744_v19, %v521_v17 }
 0x133   :  { %v532_v22 = vmul.f32 %v531_v20, %v525_v21 }
 0x135   :  { %v534_v24 = vadd.f32 %v533_v23, %v532_v22 }
 0x137   :  { %537 = vst [vmem:[#allocation8] sm:$0xff] %v534_v24  ;;  %747 = vtanh.f32 %v534_v24 }
 0x138   :  { %800 = shalt.err (!%p797_p0)
}
 0x139   :  { %558 = dma.vmem_to_hbm [thread:$0]  %s556_s27, 128, %s887_s4, [#allocation9]   ;;  %v746_v25 = vpop.eup %745 }
 0x13a   :  { %v529_v26 = vadd.f32 1.0, %v746_v25  ;;  %s842_s5 = smov [#allocation7]  }
 0x13b   :  { %s545_s6 = sshll.u32 %s842_s5, 4  ;;  %s546_s6 = int_to_ptr.vmem [resolvable:$true] %s545_s6 }
 0x13c   :  { %v530_v27 = vmul.f32 0.5, %v529_v26  ;;  %s809_s7 = scalar_lea.vmem %s546_s6, 128  ;;  %p814_p2 = scmp.lt.s32.totalorder %s546_s6, %s546_s6 }
 0x13d   :  { %p810_p1 = scmp.ne.s32.totalorder %s546_s6, %s809_s7  ;;  %p815_p3 = scmp.lt.s32.totalorder %s809_s7, %s809_s7 }
 0x13f   :  { %p816_p4 = por %p815_p3, %p814_p2 }
 0x141   :  { %p817_p5 = pnand %p816_p4, %p810_p1 }
 0x144   :  { %v748_v28 = vpop.eup %747 }
 0x145   :  { %v536_v29 = vmul.f32 %v748_v28, %v530_v27 }
 0x147   :  { %538 = vst [vmem:[#allocation7] sm:$0xff] %v536_v29 }
 0x148   :  { %820 = shalt.err (!%p817_p5)
}
 0x149   :  { %548 = dma.vmem_to_hbm [thread:$0]  %s546_s6, 128, %s886_s3, [#allocation4]  }
 0x14a   :  { %833 = dma.done.wait [#allocation4], 128  }
 0x14b   :  { %834 = vsyncadd [#allocation4], 4294967168 }
 0x14c   :  { %835 = dma.done.wait [#allocation9], 128  }
 0x14d   :  { %836 = vsyncadd [#allocation9], 4294967168 }
 0x14e   :  { %565 = vsyncpa [#allocation3], 1 }
 0x14f   :  { %566 = vsyncpa [#allocation6], 1 }
 0x150   :  { %567 = vsyncpa [#allocation4], 1 }
 0x151   :  { %568 = vsyncpa [#allocation9], 1 }

</bundles_post_ra>
